<compile_context>
chip_gen: v7x
topology: tpu7x:2x2x1
jax: 0.10.0
libtpu: 0.0.40
codegen_flags: <defaults>
</compile_context>

<pallas_src>
import jax
import jax.numpy as jnp
from jax.experimental import pallas as pl
from jax.experimental.pallas import tpu as pltpu


def _round_up(n, m):
    return ((n + m - 1) // m) * m


def critic_adv_kernel(x_ref, w1_ref, b1_ref, w2_ref, b2_ref, w3_ref, b3_ref, o_ref):
    tbr = o_ref.shape[1]                         # TB // 128
    x = x_ref[...]                               # (TB, K) f32, K = C*25, no lane pad
    # Conv2d(C, 32, 5, 5) on a 5x5 input == dense layer; then Tanh.
    h1 = jnp.tanh(
        jnp.dot(x, w1_ref[...], preferred_element_type=jnp.float32) + b1_ref[...]
    )                                            # (TB, 32)
    # Dropout(0.2): identity at inference time.
    # TODO(synk): training-mode dropout (pltpu.prng_random_bits mask) not implemented.
    h2 = jnp.tanh(
        jnp.dot(h1, w2_ref[...], preferred_element_type=jnp.float32) + b2_ref[...]
    )                                            # (TB, 16)
    # TODO(synk): if the two tanh passes bind the single EUP slot on v7x, lane-pack
    # h1/h2 (e.g. (TB,32)->(TB//4,128) via the otherwise-idle XLU) before tanh.

    # Final Linear(16 -> 1) on the VPU/XLU, emitted lane-dense:
    # (TB,16) -> (TB//128,128,16) is a free split of the sublane axis (multiple of
    # 8); the contraction over the 16 lanes then lands the batch axis in lanes, so
    # the store and the writeback DMA are dense (no (TB,1) masked-vst column).
    h2r = h2.reshape(tbr, 128, h2.shape[1])
    out = jnp.sum(h2r * w3_ref[...], axis=-1) + b3_ref[...]     # (TB//128, 128)
    o_ref[...] = out[None].astype(o_ref.dtype)                  # (1, TB//128, 128)


def critic_adv_forward(x_nchw, params, *, tb=4096):
    """x_nchw: (B, C, 5, 5) float32 -> (B, 1) float32."""
    B = x_nchw.shape[0]
    k_raw = x_nchw.shape[1] * x_nchw.shape[2] * x_nchw.shape[3]
    w1, b1, w2, b2, w3, b3 = params              # w1: (k_raw, 32), unpadded

    # Row-major flatten matches the weight reshape; metadata-only, no HBM copy.
    x_flat = x_nchw.reshape(B, k_raw)

    if B < 128:
        # Tiny batch: pad to a single 128-row tile (few-KB copy) so every block
        # stays in the well-supported "block <= array" regime.
        x_flat = jnp.pad(x_flat, ((0, 128 - B), (0, 0)))
        B_rows = 128
        TB = 128
    else:
        # TB: multiple of 128 (lane-dense output), never larger than B; no batch
        # padding — the ragged final grid step is a partial edge block (row-wise
        # compute, garbage rows are sliced off below).
        B_rows = B
        TB = min(_round_up(tb, 128), (B // 128) * 128)

    num_tiles = pl.cdiv(B_rows, TB)
    tbr = TB // 128

    out = pl.pallas_call(
        critic_adv_kernel,
        out_shape=jax.ShapeDtypeStruct((num_tiles, tbr, 128), jnp.float32),
        grid_spec=pltpu.PrefetchScalarGridSpec(
            num_scalar_prefetch=0,
            grid=(num_tiles,),
            in_specs=[
                pl.BlockSpec((TB, k_raw), lambda i: (i, 0)),   # x: streamed per tile
                pl.BlockSpec(w1.shape, lambda i: (0, 0)),      # weights: VMEM-resident
                pl.BlockSpec(b1.shape, lambda i: (0, 0)),
                pl.BlockSpec(w2.shape, lambda i: (0, 0)),
                pl.BlockSpec(b2.shape, lambda i: (0, 0)),
                pl.BlockSpec(w3.shape, lambda i: (0, 0)),
                pl.BlockSpec(b3.shape, lambda i: (0, 0)),
            ],
            out_specs=pl.BlockSpec((1, tbr, 128), lambda i: (i, 0, 0)),
        ),
        compiler_params=pltpu.CompilerParams(
            # "parallel" -> megacore sharding on v7x.
            # TODO(synk): verify in the profile that both TensorCores stream on v7x;
            # if not, switch to pltpu.CORE_PARALLEL / an explicit core axis.
            dimension_semantics=("parallel",),
            vmem_limit_bytes=32 * 1024 * 1024,
        ),
    )(x_flat, w1, b1, w2, b2, w3, b3)

    # Lane-dense (num_tiles, TB//128, 128) flattens in global row order.
    return out.reshape(-1)[:B].reshape(B, 1)


def init_params(state_dim, key):
    """Deterministic parameter init mirroring the module's shapes.

    conv:  W (32, C, 5, 5), b (32,)   -> stored as (C*25, 32), (1, 32)
    fc1:   W (16, 32), b (16,)        -> stored as (32, 16), (1, 16)
    fc2:   W (1, 16), b (1,)  orthogonal(std=0.5), bias=1e-6
                                       -> stored as a (1, 16) row, (1, 1)
    """
    k1, k2, k3, k4, k5 = jax.random.split(key, 5)
    k_raw = state_dim * 5 * 5
    lim1 = 1.0 / jnp.sqrt(float(k_raw))
    w_conv = jax.random.uniform(k1, (32, state_dim, 5, 5), jnp.float32, -lim1, lim1)
    b_conv = jax.random.uniform(k2, (32,), jnp.float32, -lim1, lim1)
    w1 = w_conv.reshape(32, -1).T                         # (C*25, 32), no padding
    b1 = b_conv.reshape(1, 32)

    lim2 = 1.0 / jnp.sqrt(32.0)
    w2 = jax.random.uniform(k3, (16, 32), jnp.float32, -lim2, lim2).T  # (32, 16)
    b2 = jax.random.uniform(k4, (16,), jnp.float32, -lim2, lim2).reshape(1, 16)

    # layer_norm(last, std=0.5): orthogonal init of a (1,16) matrix is a unit-norm
    # row scaled by std; bias constant 1e-6.
    v = jax.random.normal(k5, (16,), jnp.float32)
    v = 0.5 * v / jnp.linalg.norm(v)
    w3 = v.reshape(1, 16)                                 # (1, 16) row
    b3 = jnp.full((1, 1), 1e-6, jnp.float32)

    return (w1, b1, w2, b2, w3, b3)


def _reference(x_nchw, params):
    w1, b1, w2, b2, w3, b3 = params
    B = x_nchw.shape[0]
    xf = x_nchw.reshape(B, -1)
    h1 = jnp.tanh(xf @ w1 + b1)
    h2 = jnp.tanh(h1 @ w2 + b2)
    return h2 @ w3.T + b3


if __name__ == "__main__":
    state_dim = 4
    key = jax.random.PRNGKey(0)
    kx, kp, kx2, kx3 = jax.random.split(key, 4)
    params = init_params(state_dim, kp)

    # The module implies 5x5 spatial input: Flatten -> Linear(32,16) requires the
    # conv output to be (B, 32, 1, 1).
    B = 2
    x = jax.random.normal(kx, (B, state_dim, 5, 5), jnp.float32)
    out = jax.block_until_ready(critic_adv_forward(x, params))
    ref = _reference(x, params)
    assert out.shape == (B, 1)
    assert jnp.allclose(out, ref, atol=1e-5, rtol=1e-5)

    # Multi-tile grid with a ragged final block (no batch padding, partial edge block).
    B2 = 300
    x2 = jax.random.normal(kx2, (B2, state_dim, 5, 5), jnp.float32)
    out2 = jax.block_until_ready(critic_adv_forward(x2, params, tb=128))
    ref2 = _reference(x2, params)
    assert out2.shape == (B2, 1)
    assert jnp.allclose(out2, ref2, atol=1e-5, rtol=1e-5)

    # Wider tile on the default path (TB clamped to a 128-multiple <= B).
    B3 = 512
    x3 = jax.random.normal(kx3, (B3, state_dim, 5, 5), jnp.float32)
    out3 = jax.block_until_ready(critic_adv_forward(x3, params))
    ref3 = _reference(x3, params)
    assert out3.shape == (B3, 1)
    assert jnp.allclose(out3, ref3, atol=1e-5, rtol=1e-5)

    print("KERNEL_OK")
</pallas_src>

<mosaic_0001>
module attributes {stable_mosaic.version = 11 : i64} {
  func.func @critic_adv_kernel(%arg0: i32, %arg1: memref<128x100xf32, #tpu.memory_space<vmem>>, %arg2: memref<100x32xf32, #tpu.memory_space<vmem>>, %arg3: memref<1x32xf32, #tpu.memory_space<vmem>>, %arg4: memref<32x16xf32, #tpu.memory_space<vmem>>, %arg5: memref<1x16xf32, #tpu.memory_space<vmem>>, %arg6: memref<1x16xf32, #tpu.memory_space<vmem>>, %arg7: memref<1x1xf32, #tpu.memory_space<vmem>>, %arg8: memref<1x1x128xf32, #tpu.memory_space<vmem>>) attributes {dimension_semantics = [#tpu.dimension_semantics<parallel>], iteration_bounds = array<i64: 1>, scalar_prefetch = 0 : i64, scratch_operands = 0 : i64, tpu.core_type = #tpu.core_type<tc>, window_params = [{transform_indices = @transform_0, window_bounds = array<i64: 128, 100>}, {pipeline_mode = #tpu.pipeline_mode<synchronous>, transform_indices = @transform_1, window_bounds = array<i64: 100, 32>}, {pipeline_mode = #tpu.pipeline_mode<synchronous>, transform_indices = @transform_2, window_bounds = array<i64: 1, 32>}, {pipeline_mode = #tpu.pipeline_mode<synchronous>, transform_indices = @transform_3, window_bounds = array<i64: 32, 16>}, {pipeline_mode = #tpu.pipeline_mode<synchronous>, transform_indices = @transform_4, window_bounds = array<i64: 1, 16>}, {pipeline_mode = #tpu.pipeline_mode<synchronous>, transform_indices = @transform_5, window_bounds = array<i64: 1, 16>}, {pipeline_mode = #tpu.pipeline_mode<synchronous>, transform_indices = @transform_6, window_bounds = array<i64: 1, 1>}, {transform_indices = @transform_7, window_bounds = array<i64: 1, 1, 128>}]} {
    %c0 = arith.constant 0 : index
    %c0_0 = arith.constant 0 : index
    %0 = vector.load %arg1[%c0, %c0_0] : memref<128x100xf32, #tpu.memory_space<vmem>>, vector<128x100xf32>
    %c0_1 = arith.constant 0 : index
    %c0_2 = arith.constant 0 : index
    %1 = vector.load %arg2[%c0_1, %c0_2] : memref<100x32xf32, #tpu.memory_space<vmem>>, vector<100x32xf32>
    %cst = arith.constant dense<0.000000e+00> : vector<128x32xf32>
    %2 = tpu.matmul %0, %1, %cst {dimension_numbers = #tpu.dot_dimension_numbers<[1], [0], [0], [1], [0, 0, 1, 1], [], []>} : vector<128x100xf32>, vector<100x32xf32>, vector<128x32xf32> -> vector<128x32xf32>
    %c0_3 = arith.constant 0 : index
    %c0_4 = arith.constant 0 : index
    %3 = vector.load %arg3[%c0_3, %c0_4] : memref<1x32xf32, #tpu.memory_space<vmem>>, vector<1x32xf32>
    %4 = vector.broadcast %3 : vector<1x32xf32> to vector<128x32xf32>
    %5 = arith.addf %2, %4 : vector<128x32xf32>
    %6 = math.tanh %5 : vector<128x32xf32>
    %c0_5 = arith.constant 0 : index
    %c0_6 = arith.constant 0 : index
    %7 = vector.load %arg4[%c0_5, %c0_6] : memref<32x16xf32, #tpu.memory_space<vmem>>, vector<32x16xf32>
    %cst_7 = arith.constant dense<0.000000e+00> : vector<128x16xf32>
    %8 = tpu.matmul %6, %7, %cst_7 {dimension_numbers = #tpu.dot_dimension_numbers<[1], [0], [0], [1], [0, 0, 1, 1], [], []>} : vector<128x32xf32>, vector<32x16xf32>, vector<128x16xf32> -> vector<128x16xf32>
    %c0_8 = arith.constant 0 : index
    %c0_9 = arith.constant 0 : index
    %9 = vector.load %arg5[%c0_8, %c0_9] : memref<1x16xf32, #tpu.memory_space<vmem>>, vector<1x16xf32>
    %10 = vector.broadcast %9 : vector<1x16xf32> to vector<128x16xf32>
    %11 = arith.addf %8, %10 : vector<128x16xf32>
    %12 = math.tanh %11 : vector<128x16xf32>
    %13 = vector.shape_cast %12 : vector<128x16xf32> to vector<1x128x16xf32>
    %c0_10 = arith.constant 0 : index
    %c0_11 = arith.constant 0 : index
    %14 = vector.load %arg6[%c0_10, %c0_11] : memref<1x16xf32, #tpu.memory_space<vmem>>, vector<1x16xf32>
    %15 = vector.shape_cast %14 : vector<1x16xf32> to vector<1x1x16xf32>
    %16 = vector.broadcast %15 : vector<1x1x16xf32> to vector<1x128x16xf32>
    %17 = arith.mulf %13, %16 : vector<1x128x16xf32>
    %cst_12 = arith.constant dense<0.000000e+00> : vector<1x128xf32>
    %18 = vector.multi_reduction <add>, %17, %cst_12 [2] : vector<1x128x16xf32> to vector<1x128xf32>
    %c0_13 = arith.constant 0 : index
    %c0_14 = arith.constant 0 : index
    %19 = vector.load %arg7[%c0_13, %c0_14] : memref<1x1xf32, #tpu.memory_space<vmem>>, vector<1x1xf32>
    %20 = vector.broadcast %19 : vector<1x1xf32> to vector<1x128xf32>
    %21 = arith.addf %18, %20 : vector<1x128xf32>
    %22 = vector.shape_cast %21 : vector<1x128xf32> to vector<1x1x128xf32>
    %c0_15 = arith.constant 0 : index
    %c0_16 = arith.constant 0 : index
    %c0_17 = arith.constant 0 : index
    %23 = vector.load %arg8[%c0_15, %c0_16, %c0_17] : memref<1x1x128xf32, #tpu.memory_space<vmem>>, vector<1x1x128xf32>
    tpu.vector_store %arg8[%c0_15, %c0_16, %c0_17], %22 {strides = array<i32>} : memref<1x1x128xf32, #tpu.memory_space<vmem>>, vector<1x1x128xf32>,
    return
  }
  func.func @transform_0(%arg0: i32) -> (i32, i32) {
    %c0_i32 = arith.constant 0 : i32
    %c0_i32_0 = arith.constant 0 : i32
    return %arg0, %c0_i32 : i32, i32
  }
  func.func @transform_1(%arg0: i32) -> (i32, i32) {
    %c0_i32 = arith.constant 0 : i32
    %c0_i32_0 = arith.constant 0 : i32
    %c0_i32_1 = arith.constant 0 : i32
    return %c0_i32, %c0_i32_0 : i32, i32
  }
  func.func @transform_2(%arg0: i32) -> (i32, i32) {
    %c0_i32 = arith.constant 0 : i32
    %c0_i32_0 = arith.constant 0 : i32
    %c0_i32_1 = arith.constant 0 : i32
    return %c0_i32, %c0_i32_0 : i32, i32
  }
  func.func @transform_3(%arg0: i32) -> (i32, i32) {
    %c0_i32 = arith.constant 0 : i32
    %c0_i32_0 = arith.constant 0 : i32
    %c0_i32_1 = arith.constant 0 : i32
    return %c0_i32, %c0_i32_0 : i32, i32
  }
  func.func @transform_4(%arg0: i32) -> (i32, i32) {
    %c0_i32 = arith.constant 0 : i32
    %c0_i32_0 = arith.constant 0 : i32
    %c0_i32_1 = arith.constant 0 : i32
    return %c0_i32, %c0_i32_0 : i32, i32
  }
  func.func @transform_5(%arg0: i32) -> (i32, i32) {
    %c0_i32 = arith.constant 0 : i32
    %c0_i32_0 = arith.constant 0 : i32
    %c0_i32_1 = arith.constant 0 : i32
    return %c0_i32, %c0_i32_0 : i32, i32
  }
  func.func @transform_6(%arg0: i32) -> (i32, i32) {
    %c0_i32 = arith.constant 0 : i32
    %c0_i32_0 = arith.constant 0 : i32
    %c0_i32_1 = arith.constant 0 : i32
    return %c0_i32, %c0_i32_0 : i32, i32
  }
  func.func @transform_7(%arg0: i32) -> (i32, i32, i32) {
    %c0_i32 = arith.constant 0 : i32
    %c0_i32_0 = arith.constant 0 : i32
    %c0_i32_1 = arith.constant 0 : i32
    return %arg0, %c0_i32, %c0_i32_0 : i32, i32, i32
  }
}

</mosaic_0001>

<bundles_post_ra>
// kernel: tpu_custom_call.1
= control target key start
LH: loop header
LB: loop body
LE: loop exit
PB: predicated region body
PF: predicated region fallthrough
CT: control target
= control target key end

     0   :  { %s1356_s0 = inlined_call_operand.vmem [shape: f32[128,100], index: 0, kind: input, shape index: {}]   ;;  %s1357_s1 = inlined_call_operand.vmem [shape: f32[100,32], index: 1, kind: input, shape index: {}]   ;;  %s1358_s2 = inlined_call_operand.vmem [shape: f32[1,32], index: 2, kind: input, shape index: {}]   ;;  %s1359_s3 = inlined_call_operand.vmem [shape: f32[32,16], index: 3, kind: input, shape index: {}]   ;;  %s1360_s4 = inlined_call_operand.vmem [shape: f32[1,16], index: 4, kind: input, shape index: {}]   ;;  %s1361_s5 = inlined_call_operand.vmem [shape: f32[1,16], index: 5, kind: input, shape index: {}]   ;;  %s1362_s6 = inlined_call_operand.<no memory space> [shape: f32[1,1], index: 6, kind: input, shape index: {}]   ;;  %s1363_s7 = inlined_call_operand.hbm [shape: f32[1,1,128], index: 7, kind: output, shape index: {}]  }
   0x1   :  { %v12_v0 = vstv %s1362_s6 }
   0x2   :  { %13 = vst [vmem:[#allocation2] sm:$0x1] %v12_v0 }
   0x3   :  { %v45_v1 = vld [vmem:[%s1357_s1] sm:$0xff]  ;;  %v46_v2 = vld [vmem:[%s1357_s1 + $0x8] sm:$0xff]  ;;  %v47_v3 = vld [vmem:[%s1357_s1 + $0x10] sm:$0xff]  ;;  %vm65_vm0 = vcmask 818176  }
   0x4   :  { %v908_v4 = vpack.c.bf16 %v46_v2, %v45_v1  ;;  %v48_v5 = vld [vmem:[%s1357_s1 + $0x18] sm:$0xff]  ;;  %v49_v7 = vld [vmem:[%s1357_s1 + $0x20] sm:$0xff]  ;;  %v50_v8 = vld [vmem:[%s1357_s1 + $0x28] sm:$0xff] }
   0x5   :  { %v912_v6 = vpack.c.bf16 %v48_v5, %v47_v3  ;;  %v29_v9 = vld [vmem:[%s1356_s0] sm:$0xff]  ;;  %v916_v10 = vpack.c.bf16 %v50_v8, %v49_v7  ;;  %v51_v11 = vld [vmem:[%s1357_s1 + $0x30] sm:$0xff]  ;;  %v52_v12 = vld [vmem:[%s1357_s1 + $0x38] sm:$0xff] }
   0x6   :  { %909 = vmatprep.subr.bf16.mxu0 %v908_v4  ;;  %852 = vmatprep.mubr.msk.f32.mxu0 %vm65_vm0, %v29_v9  ;;  %v920_v13 = vpack.c.bf16 %v52_v12, %v51_v11 }
   0x7   :  { %911 = vmatpush3.bf16.msra.mxu0 %v908_v4 }
   0x8   :  { %913 = vmatprep.subr.bf16.mxu0 %v912_v6 }
   0xb   :  { %915 = vmatpush3.bf16.msra.mxu0 %v912_v6 }
   0xc   :  { %917 = vmatprep.subr.bf16.mxu0 %v916_v10 }
   0xd   :  { %14 = vsyncpa [#allocation4], 0  ;;  %v53_v14 = vld [vmem:[%s1357_s1 + $0x40] sm:$0xff]  ;;  %v54_v15 = vld [vmem:[%s1357_s1 + $0x48] sm:$0xff]  ;;  %vm114_vm1 = vcmask 1043456   ;;  %vm290_vm2 = vcmask 261120  }
   0xe   :  { %v924_v16 = vpack.c.bf16 %v54_v15, %v53_v14  ;;  %v55_v17 = vld [vmem:[%s1357_s1 + $0x50] sm:$0xff]  ;;  %v56_v18 = vld [vmem:[%s1357_s1 + $0x58] sm:$0xff]  ;;  %v57_v20 = vld [vmem:[%s1357_s1 + $0x60] sm:$0xf]  ;;  %vm523_vm3 = vcmask 130048   ;;  %vm625_vm4 = vcmask 130112  }
   0xf   :  { %919 = vmatpush3.bf16.msra.mxu0 %v916_v10  ;;  %v928_v19 = vpack.c.bf16 %v56_v18, %v55_v17  ;;  %v30_v21 = vld [vmem:[%s1356_s0 + $0x8] sm:$0xff]  ;;  %v31_v22 = vld [vmem:[%s1356_s0 + $0x10] sm:$0xff]  ;;  %v32_v23 = vld [vmem:[%s1356_s0 + $0x18] sm:$0xff]  ;;  %vm632_vm5 = vcmask 195712   ;;  %vm639_vm6 = vcmask 261312   ;;  %vm646_vm7 = vcmask 326912  }
  0x10   :  { %921 = vmatprep.subr.bf16.mxu0 %v920_v13  ;;  %v33_v24 = vld [vmem:[%s1356_s0 + $0x20] sm:$0xff]  ;;  %v34_v25 = vld [vmem:[%s1356_s0 + $0x28] sm:$0xff]  ;;  %v35_v26 = vld [vmem:[%s1356_s0 + $0x30] sm:$0xff]  ;;  %vm653_vm8 = vcmask 392512   ;;  %vm660_vm9 = vcmask 458112   ;;  %vm667_vm10 = vcmask 523712  }
  0x11   :  { %v36_v27 = vld [vmem:[%s1356_s0 + $0x38] sm:$0xff]  ;;  %v37_v28 = vld [vmem:[%s1356_s0 + $0x40] sm:$0xff]  ;;  %v38_v29 = vld [vmem:[%s1356_s0 + $0x48] sm:$0xff]  ;;  %vm674_vm11 = vcmask 589312   ;;  %vm681_vm12 = vcmask 654912   ;;  %vm688_vm13 = vcmask 720512  }
  0x12   :  { %v39_v30 = vld [vmem:[%s1356_s0 + $0x50] sm:$0xff]  ;;  %v40_v31 = vld [vmem:[%s1356_s0 + $0x58] sm:$0xff]  ;;  %v41_v32 = vld [vmem:[%s1356_s0 + $0x60] sm:$0xff]  ;;  %vm695_vm14 = vcmask 786112   ;;  %vm702_vm15 = vcmask 851712  }
  0x13   :  { %923 = vmatpush3.bf16.msra.mxu0 %v920_v13  ;;  %v42_v33 = vld [vmem:[%s1356_s0 + $0x68] sm:$0xff]  ;;  %v43_v34 = vld [vmem:[%s1356_s0 + $0x70] sm:$0xff]  ;;  %v44_v35 = vld [vmem:[%s1356_s0 + $0x78] sm:$0xff] }
  0x14   :  { %925 = vmatprep.subr.bf16.mxu0 %v924_v16  ;;  %v279_v36 = vld [vmem:[%s1359_s3] sm:$0xff]  ;;  %v280_v37 = vld [vmem:[%s1359_s3 + $0x8] sm:$0xff]  ;;  %v281_v39 = vld [vmem:[%s1359_s3 + $0x10] sm:$0xff] }
  0x15   :  { %v932_v38 = vpack.c.bf16 %v280_v37, %v279_v36  ;;  %v282_v40 = vld [vmem:[%s1359_s3 + $0x18] sm:$0xff]  ;;  %v1195_v42 = vld [vmem:[%s1358_s2] ss:$0 sm:$0xff] }
  0x16   :  { %v936_v41 = vpack.c.bf16 %v282_v40, %v281_v39 }
  0x17   :  { %927 = vmatpush3.bf16.msra.mxu0 %v924_v16  ;;  %933 = vmatprep.subr.bf16.mxu1 %v932_v38 }
  0x18   :  { %929 = vmatprep.subr.bf16.mxu0 %v928_v19  ;;  %935 = vmatpush3.bf16.msra.mxu1 %v932_v38 }
  0x19   :  { %937 = vmatprep.subr.bf16.mxu1 %v936_v41 }
  0x1b   :  { %931 = vmatpush3.bf16.msra.mxu0 %v928_v19 }
  0x1c   :  { %850 = vmatprep.subr.msk.mxu0 %vm114_vm1, %v57_v20  ;;  %939 = vmatpush3.bf16.msra.mxu1 %v936_v41  ;;  %v1243_v41 = vld [vmem:[%s1361_s5] ss:$0 sm:$0xff]  ;;  %s1033_s5 = smov [#allocation3]  }
  0x1d   :  { %s733_s20 = sshll.u32 %s1033_s5, 4  ;;  %s734_s20 = int_to_ptr.vmem [resolvable:$true] %s733_s20 }
  0x1e   :  { %s1008_s21 = scalar_lea.vmem %s734_s20, 16  ;;  %s1012_s22 = scalar_lea.vmem %s734_s20, 32 }
  0x1f   :  { %851 = vmatpush3.msk.msra.mxu0 %vm114_vm1, %v57_v20  ;;  %vm716_vm1 = vcmask 982912   ;;  %p1009_p0 = scmp.ne.s32.totalorder %s734_s20, %s1008_s21  ;;  %p1013_p1 = scmp.lt.s32.totalorder %s734_s20, %s734_s20 }
  0x20   :  { %853 = vmatmul.mubr.msk.f32.vlgmr.msra.gmra.mrb[0].mxu0 %vm65_vm0, %v30_v21  ;;  %p1014_p2 = scmp.lt.s32.totalorder %s1012_s22, %s1008_s21 }
  0x21   :  { %855 = vmatprep.mubr.msk.f32.mxu0 %vm65_vm0, %v31_v22 }
  0x22   :  { %p1015_p3 = por %p1014_p2, %p1013_p1 }
  0x24   :  { %856 = vmatmul.mubr.msk.f32.gmra.mrb[2].mxu0 %vm65_vm0, %v32_v23  ;;  %p1016_p4 = pnand %p1015_p3, %p1009_p0 }
  0x25   :  { %858 = vmatprep.mubr.msk.f32.mxu0 %vm65_vm0, %v33_v24 }
  0x28   :  { %859 = vmatmul.mubr.msk.f32.gmra.mrb[4].mxu0 %vm65_vm0, %v34_v25 }
  0x29   :  { %861 = vmatprep.mubr.msk.f32.mxu0 %vm65_vm0, %v35_v26 }
  0x2c   :  { %862 = vmatmul.mubr.msk.f32.gmra.mrb[6].mxu0 %vm65_vm0, %v36_v27  ;;  %v1032_v27 = vmov 0  }
  0x2d   :  { %864 = vmatprep.mubr.msk.f32.mxu0 %vm65_vm0, %v37_v28  ;;  %942 = vset.pattern.permute.xlu1 %v1032_v27  ;;  %v1232_v28 = vld [vmem:[%s1360_s4] ss:$0 sm:$0xff] }
  0x2e   :  { %943 = vset.pattern.permute.xlu0 %v1032_v27 }
  0x30   :  { %865 = vmatmul.mubr.msk.f32.gmra.mrb[8].mxu0 %vm65_vm0, %v38_v29 }
  0x31   :  { %867 = vmatprep.mubr.msk.f32.mxu0 %vm65_vm0, %v39_v30 }
  0x34   :  { %868 = vmatmul.mubr.msk.f32.gmra.mrb[10].mxu0 %vm65_vm0, %v40_v31 }
  0x35   :  { %870 = vmatprep.mubr.msk.f32.mxu0 %vm65_vm0, %v41_v32 }
  0x38   :  { %871 = vmatmul.mubr.msk.f32.gmra.mrb[12].mxu0 %vm65_vm0, %v42_v33 }
  0x39   :  { %873 = vmatprep.mubr.msk.f32.mxu0 %vm65_vm0, %v43_v34 }
  0x3c   :  { %874 = vmatmul.mubr.msk.f32.gmra.mrb[14].mxu0 %vm65_vm0, %v44_v35  ;;  %vm709_vm0 = vcmask 917312  }
  0xf3   :  { %v854_v43 = vpop.f32.mrb[0].mxu0 }
  0xf4   :  { %v190_v44 = vadd.f32 %v854_v43, %v1195_v42  ;;  %v184_v45 = vpop.f32.mrb[1].mxu0 }
  0xf5   :  { %v185_v46 = vadd.f32 %v1195_v42, %v184_v45 }
  0xf7   :  { %944 = vtanh.f32 %v185_v46  ;;  %v857_v47 = vpop.f32.mrb[2].mxu0 }
  0xf8   :  { %946 = vtanh.f32 %v190_v44  ;;  %v200_v48 = vadd.f32 %v857_v47, %v1195_v42  ;;  %v194_v49 = vpop.f32.mrb[3].mxu0 }
  0xf9   :  { %v195_v50 = vadd.f32 %v1195_v42, %v194_v49 }
  0xfb   :  { %948 = vtanh.f32 %v195_v50  ;;  %v860_v51 = vpop.f32.mrb[4].mxu0 }
  0xfc   :  { %950 = vtanh.f32 %v200_v48  ;;  %v210_v52 = vadd.f32 %v860_v51, %v1195_v42  ;;  %v204_v53 = vpop.f32.mrb[5].mxu0 }
  0xfd   :  { %v205_v54 = vadd.f32 %v1195_v42, %v204_v53 }
  0xfe   :  { %952 = vtanh.f32 %v210_v52 }
  0xff   :  { %954 = vtanh.f32 %v205_v54  ;;  %v863_v55 = vpop.f32.mrb[6].mxu0 }
 0x100   :  { %v220_v56 = vadd.f32 %v863_v55, %v1195_v42  ;;  %v214_v57 = vpop.f32.mrb[7].mxu0 }
 0x101   :  { %v945_v58 = vpop.eup %944  ;;  %v215_v59 = vadd.f32 %v1195_v42, %v214_v57 }
 0x102   :  { %v947_v60 = vpop.eup %946  ;;  %956 = vtanh.f32 %v220_v56  ;;  %884 = vmatprep.mubr.msk.f32.mxu1 %vm290_vm2, %v945_v58 }
 0x103   :  { %958 = vtanh.f32 %v215_v59  ;;  %885 = vmatmul.mubr.msk.f32.vlgmr.msra.gmra.mrb[0].mxu1 %vm290_vm2, %v947_v60  ;;  %v866_v61 = vpop.f32.mrb[8].mxu0 }
 0x104   :  { %v230_v62 = vadd.f32 %v866_v61, %v1195_v42  ;;  %v224_v63 = vpop.f32.mrb[9].mxu0 }
 0x105   :  { %v949_v0 = vpop.eup %948  ;;  %v225_v1 = vadd.f32 %v1195_v42, %v224_v63 }
 0x106   :  { %v951_v2 = vpop.eup %950  ;;  %887 = vmatprep.mubr.msk.f32.mxu1 %vm290_vm2, %v949_v0  ;;  %960 = vtanh.f32 %v230_v62 }
 0x107   :  { %888 = vmatmul.mubr.msk.f32.gmra.mrb[2].mxu1 %vm290_vm2, %v951_v2  ;;  %962 = vtanh.f32 %v225_v1  ;;  %v869_v3 = vpop.f32.mrb[10].mxu0 }
 0x108   :  { %v953_v4 = vpop.eup %952  ;;  %v240_v5 = vadd.f32 %v869_v3, %v1195_v42  ;;  %v234_v6 = vpop.f32.mrb[11].mxu0 }
 0x109   :  { %v955_v7 = vpop.eup %954  ;;  %v235_v8 = vadd.f32 %v1195_v42, %v234_v6 }
 0x10a   :  { %890 = vmatprep.mubr.msk.f32.mxu1 %vm290_vm2, %v955_v7  ;;  %964 = vtanh.f32 %v240_v5 }
 0x10b   :  { %891 = vmatmul.mubr.msk.f32.gmra.mrb[4].mxu1 %vm290_vm2, %v953_v4  ;;  %966 = vtanh.f32 %v235_v8  ;;  %v872_v9 = vpop.f32.mrb[12].mxu0 }
 0x10c   :  { %v957_v10 = vpop.eup %956  ;;  %v250_v11 = vadd.f32 %v872_v9, %v1195_v42  ;;  %v244_v12 = vpop.f32.mrb[13].mxu0 }
 0x10d   :  { %v959_v13 = vpop.eup %958  ;;  %v245_v14 = vadd.f32 %v1195_v42, %v244_v12 }
 0x10e   :  { %893 = vmatprep.mubr.msk.f32.mxu1 %vm290_vm2, %v959_v13  ;;  %968 = vtanh.f32 %v250_v11 }
 0x10f   :  { %894 = vmatmul.mubr.msk.f32.gmra.mrb[6].mxu1 %vm290_vm2, %v957_v10  ;;  %970 = vtanh.f32 %v245_v14  ;;  %v875_v15 = vpop.f32.mrb[14].mxu0 }
 0x110   :  { %v961_v16 = vpop.eup %960  ;;  %v260_v17 = vadd.f32 %v875_v15, %v1195_v42  ;;  %v254_v18 = vpop.f32.mrb[15].mxu0 }
 0x111   :  { %v963_v19 = vpop.eup %962  ;;  %v255_v20 = vadd.f32 %v1195_v42, %v254_v18 }
 0x112   :  { %896 = vmatprep.mubr.msk.f32.mxu1 %vm290_vm2, %v963_v19  ;;  %972 = vtanh.f32 %v260_v17 }
 0x113   :  { %897 = vmatmul.mubr.msk.f32.gmra.mrb[8].mxu1 %vm290_vm2, %v961_v16  ;;  %974 = vtanh.f32 %v255_v20 }
 0x114   :  { %v965_v21 = vpop.eup %964 }
 0x115   :  { %v967_v22 = vpop.eup %966 }
 0x116   :  { %899 = vmatprep.mubr.msk.f32.mxu1 %vm290_vm2, %v967_v22 }
 0x117   :  { %900 = vmatmul.mubr.msk.f32.gmra.mrb[10].mxu1 %vm290_vm2, %v965_v21 }
 0x118   :  { %v969_v23 = vpop.eup %968 }
 0x119   :  { %v971_v24 = vpop.eup %970 }
 0x11a   :  { %902 = vmatprep.mubr.msk.f32.mxu1 %vm290_vm2, %v971_v24 }
 0x11b   :  { %903 = vmatmul.mubr.msk.f32.gmra.mrb[12].mxu1 %vm290_vm2, %v969_v23 }
 0x11c   :  { %v973_v25 = vpop.eup %972 }
 0x11d   :  { %v975_v26 = vpop.eup %974 }
 0x11e   :  { %905 = vmatprep.mubr.msk.f32.mxu1 %vm290_vm2, %v975_v26 }
 0x11f   :  { %906 = vmatmul.mubr.msk.f32.gmra.mrb[14].mxu1 %vm290_vm2, %v973_v25  ;;  %vm723_vm2 = vcmask 1048512  }
 0x1d6   :  { %v886_v29 = vpop.f32.mrb[0].mxu1 }
 0x1d7   :  { %v411_v30 = vadd.f32 %v886_v29, %v1232_v28  ;;  %v405_v31 = vpop.f32.mrb[1].mxu1 }
 0x1d8   :  { %v406_v32 = vadd.f32 %v1232_v28, %v405_v31 }
 0x1d9   :  { %976 = vtanh.f32 %v411_v30 }
 0x1da   :  { %978 = vtanh.f32 %v406_v32  ;;  %v889_v33 = vpop.f32.mrb[2].mxu1 }
 0x1db   :  { %v421_v34 = vadd.f32 %v889_v33, %v1232_v28  ;;  %v415_v35 = vpop.f32.mrb[3].mxu1 }
 0x1dc   :  { %v416_v36 = vadd.f32 %v1232_v28, %v415_v35  ;;  %v572_v35 = vld [vmem:[#allocation2] sm:$0x1] }
 0x1dd   :  { %980 = vtanh.f32 %v421_v34 }
 0x1de   :  { %982 = vtanh.f32 %v416_v36  ;;  %v892_v37 = vpop.f32.mrb[4].mxu1 }
 0x1df   :  { %v431_v38 = vadd.f32 %v892_v37, %v1232_v28  ;;  %v425_v39 = vpop.f32.mrb[5].mxu1 }
 0x1e0   :  { %v426_v40 = vadd.f32 %v1232_v28, %v425_v39 }
 0x1e1   :  { %984 = vtanh.f32 %v431_v38 }
 0x1e2   :  { %986 = vtanh.f32 %v426_v40  ;;  %v895_v42 = vpop.f32.mrb[6].mxu1 }
 0x1e3   :  { %v977_v43 = vpop.eup %976  ;;  %v441_v44 = vadd.f32 %v895_v42, %v1232_v28  ;;  %v435_v45 = vpop.f32.mrb[7].mxu1 }
 0x1e4   :  { %v979_v46 = vpop.eup %978  ;;  %v508_v47 = vmul.f32 %v977_v43, %v1243_v41  ;;  %v436_v48 = vadd.f32 %v1232_v28, %v435_v45 }
 0x1e5   :  { %988 = vtanh.f32 %v441_v44  ;;  %v507_v51 = vmul.f32 %v979_v46, %v1243_v41 }
 0x1e6   :  { %v527_v49 = vsel %vm523_vm3, %v508_v47, 0.0  ;;  %990 = vtanh.f32 %v436_v48  ;;  %v898_v50 = vpop.f32.mrb[8].mxu1 }
 0x1e7   :  { %v981_v52 = vpop.eup %980  ;;  %528 = vadd.xlane.f32.xlu0 %v527_v49  ;;  %v451_v53 = vadd.f32 %v898_v50, %v1232_v28  ;;  %v445_v54 = vpop.f32.mrb[9].mxu1  ;;  %v524_v59 = vsel %vm523_vm3, %v507_v51, 0.0 }
 0x1e8   :  { %v983_v55 = vpop.eup %982  ;;  %v510_v56 = vmul.f32 %v981_v52, %v1243_v41  ;;  %v446_v57 = vadd.f32 %v1232_v28, %v445_v54  ;;  %v578_v54 = vlaneseq }
 0x1e9   :  { %992 = vtanh.f32 %v451_v53  ;;  %v509_v60 = vmul.f32 %v983_v55, %v1243_v41 }
 0x1ea   :  { %v533_v58 = vsel %vm523_vm3, %v510_v56, 0.0  ;;  %v901_v61 = vpop.f32.mrb[10].mxu1  ;;  %994 = vtanh.f32 %v446_v57  ;;  %v1287_v57 = vshrl.u32 %v578_v54, 7 }
 0x1eb   :  { %v985_v62 = vpop.eup %984  ;;  %534 = vadd.xlane.f32.xlu1 %v533_v58  ;;  %525 = vadd.xlane.f32.xlu0 %v524_v59  ;;  %v461_v63 = vadd.f32 %v901_v61, %v1232_v28  ;;  %v455_v0 = vpop.f32.mrb[11].mxu1  ;;  %v530_v4 = vsel %vm523_vm3, %v509_v60, 0.0  ;;  %v1290_v59 = vand.u32 127, %v578_v54 }
 0x1ec   :  { %v987_v1 = vpop.eup %986  ;;  %v456_v2 = vadd.f32 %v1232_v28, %v455_v0  ;;  %v512_v5 = vmul.f32 %v985_v62, %v1243_v41  ;;  %v580_v58 = vsub.s32 0, %v1287_v57 }
 0x1ed   :  { %v511_v3 = vmul.f32 %v987_v1, %v1243_v41  ;;  %996 = vtanh.f32 %v461_v63  ;;  %v620_v62 = vadd.s32 4294967288, %v1290_v59  ;;  %v627_v63 = vadd.s32 4294967280, %v1290_v59 }
 0x1ee   :  { %v904_v6 = vpop.f32.mrb[12].mxu1  ;;  %998 = vtanh.f32 %v456_v2  ;;  %v539_v14 = vsel %vm523_vm3, %v512_v5, 0.0  ;;  %v704_v54 = vadd.s32 4294967192, %v1290_v59 }
 0x1ef   :  { %v989_v7 = vpop.eup %988  ;;  %531 = vadd.xlane.f32.xlu1 %v530_v4  ;;  %v536_v8 = vsel %vm523_vm3, %v511_v3, 0.0  ;;  %v465_v9 = vpop.f32.mrb[13].mxu1  ;;  %v471_v12 = vadd.f32 %v904_v6, %v1232_v28  ;;  %v618_v3 = vsub.s32 %v1290_v59, %v1287_v57  ;;  %v623_v4 = vsub.s32 %v620_v62, %v1287_v57 }
 0x1f0   :  { %v991_v10 = vpop.eup %990  ;;  %537 = vadd.xlane.f32.xlu0 %v536_v8  ;;  %v514_v11 = vmul.f32 %v989_v7, %v1243_v41  ;;  %v466_v19 = vadd.f32 %v1232_v28, %v465_v9  ;;  %v630_v6 = vsub.s32 %v627_v63, %v1287_v57  ;;  %v634_v9 = vadd.s32 4294967272, %v1290_v59 }
 0x1f1   :  { %v513_v13 = vmul.f32 %v991_v10, %v1243_v41  ;;  %1000 = vtanh.f32 %v471_v12  ;;  %v641_v12 = vadd.s32 4294967264, %v1290_v59 }
 0x1f2   :  { %v545_v15 = vsel %vm523_vm3, %v514_v11, 0.0  ;;  %v907_v16 = vpop.f32.mrb[14].mxu1  ;;  %1002 = vtanh.f32 %v466_v19 }
 0x1f3   :  { %v993_v17 = vpop.eup %992  ;;  %540 = vadd.xlane.f32.xlu1 %v539_v14  ;;  %v475_v18 = vpop.f32.mrb[15].mxu1  ;;  %v542_v20 = vsel %vm523_vm3, %v513_v13, 0.0  ;;  %v481_v31 = vadd.f32 %v907_v16, %v1232_v28  ;;  %v648_v16 = vadd.s32 4294967256, %v1290_v59  ;;  %v644_v19 = vsub.s32 %v641_v12, %v1287_v57 }
 0x1f4   :  { %546 = vadd.xlane.f32.xlu0 %v545_v15  ;;  %v516_v21 = vmul.f32 %v993_v17, %v1243_v41  ;;  %v995_v22 = vpop.eup %994  ;;  %v476_v24 = vadd.f32 %v1232_v28, %v475_v18  ;;  %v637_v15 = vsub.s32 %v634_v9, %v1287_v57 }
 0x1f5   :  { %v515_v27 = vmul.f32 %v995_v22, %v1243_v41  ;;  %v655_v22 = vadd.s32 4294967248, %v1290_v59 }
 0x1f6   :  { %v551_v26 = vsel %vm523_vm3, %v516_v21, 0.0  ;;  %1004 = vtanh.f32 %v476_v24 }
 0x1f7   :  { %v997_v23 = vpop.eup %996  ;;  %v548_v32 = vsel %vm523_vm3, %v515_v27, 0.0  ;;  %1006 = vtanh.f32 %v481_v31  ;;  %v658_v27 = vsub.s32 %v655_v22, %v1287_v57 }
 0x1f8   :  { %543 = vadd.xlane.f32.xlu0 %v542_v20  ;;  %v518_v25 = vmul.f32 %v997_v23, %v1243_v41  ;;  %v999_v29 = vpop.eup %998 }
 0x1f9   :  { %v517_v33 = vmul.f32 %v999_v29, %v1243_v41  ;;  %v662_v29 = vadd.s32 4294967240, %v1290_v59 }
 0x1fa   :  { %v557_v30 = vsel %vm523_vm3, %v518_v25, 0.0  ;;  %v651_v25 = vsub.s32 %v648_v16, %v1287_v57 }
 0x1fb   :  { %v1001_v34 = vpop.eup %1000  ;;  %v554_v36 = vsel %vm523_vm3, %v517_v33, 0.0 }
 0x1fc   :  { %552 = vadd.xlane.f32.xlu0 %v551_v26  ;;  %v520_v37 = vmul.f32 %v1001_v34, %v1243_v41  ;;  %v1003_v38 = vpop.eup %1002 }
 0x1fd   :  { %v519_v28 = vmul.f32 %v1003_v38, %v1243_v41  ;;  %v665_v38 = vsub.s32 %v662_v29, %v1287_v57 }
 0x1fe   :  { %v563_v39 = vsel %vm523_vm3, %v520_v37, 0.0 }
 0x1ff   :  { %v560_v42 = vsel %vm523_vm3, %v519_v28, 0.0 }
 0x200   :  { %549 = vadd.xlane.f32.xlu0 %v548_v32  ;;  %v1005_v40 = vpop.eup %1004  ;;  %v669_v32 = vadd.s32 4294967232, %v1290_v59 }
 0x201   :  { %v521_v43 = vmul.f32 %v1005_v40, %v1243_v41  ;;  %v1007_v44 = vpop.eup %1006 }
 0x202   :  { %v522_v46 = vmul.f32 %v1007_v44, %v1243_v41  ;;  %v672_v28 = vsub.s32 %v669_v32, %v1287_v57 }
 0x203   :  { %v566_v45 = vsel %vm523_vm3, %v521_v43, 0.0 }
 0x204   :  { %575 = vperm.xlu1 %942, %v572_v35   ;;  %555 = vadd.xlane.f32.xlu0 %v554_v36  ;;  %v569_v47 = vsel %vm523_vm3, %v522_v46, 0.0  ;;  %v676_v35 = vadd.s32 4294967224, %v1290_v59 }
 0x208   :  { %564 = vadd.xlane.f32.xlu0 %v563_v39 }
 0x20c   :  { %561 = vadd.xlane.f32.xlu0 %v560_v42  ;;  %v683_v42 = vadd.s32 4294967216, %v1290_v59 }
 0x210   :  { %567 = vadd.xlane.f32.xlu0 %v566_v45  ;;  %v679_v45 = vsub.s32 %v676_v35, %v1287_v57 }
 0x214   :  { %570 = vadd.xlane.f32.xlu0 %v569_v47  ;;  %v690_v47 = vadd.s32 4294967208, %v1290_v59 }
 0x228   :  { %558 = vadd.xlane.f32.xlu1 %v557_v30 }
 0x274   :  { %v529_v48 = vpop.xlane.xlu0 %528 }
 0x278   :  { %v526_v49 = vpop.xlane.xlu0 %525  ;;  %v535_v50 = vpop.xlane.xlu1 %534 }
 0x27c   :  { %v532_v52 = vpop.xlane.xlu1 %531 }
 0x27d   :  { %v538_v51 = vpop.xlane.xlu0 %537 }
 0x280   :  { %v541_v55 = vpop.xlane.xlu1 %540 }
 0x281   :  { %v547_v53 = vpop.xlane.xlu0 %546 }
 0x284   :  { %v576_v41 = vpop.permute.xlu1 %575 }
 0x285   :  { %v544_v56 = vpop.xlane.xlu0 %543  ;;  %v1292_v61 = vrot.slane %v576_v41, %v580_v58  ;;  %v693_v58 = vsub.s32 %v690_v47, %v1287_v57 }
 0x287   :  { %v582_v1 = vadd.f32 %v1292_v61, %v526_v49  ;;  %v583_v2 = vadd.f32 %v1292_v61, %v529_v48  ;;  %v584_v5 = vadd.f32 %v1292_v61, %v532_v52  ;;  %v585_v13 = vadd.f32 %v1292_v61, %v535_v50 }
 0x288   :  { %v586_v17 = vadd.f32 %v1292_v61, %v538_v51  ;;  %v587_v23 = vadd.f32 %v1292_v61, %v541_v55  ;;  %v588_v31 = vadd.f32 %v1292_v61, %v544_v56  ;;  %v589_v37 = vadd.f32 %v1292_v61, %v547_v53 }
 0x289   :  { %v553_v60 = vpop.xlane.xlu0 %552  ;;  %v619_v7 = vrot.slane %v582_v1, %v618_v3  ;;  %v624_v8 = vrot.slane %v583_v2, %v623_v4  ;;  %v631_v11 = vrot.slane %v584_v5, %v630_v6  ;;  %v638_v21 = vrot.slane %v585_v13, %v637_v15 }
 0x28a   :  { %v645_v26 = vrot.slane %v586_v17, %v644_v19  ;;  %v652_v34 = vrot.slane %v587_v23, %v651_v25  ;;  %v659_v39 = vrot.slane %v588_v31, %v658_v27  ;;  %v666_v46 = vrot.slane %v589_v37, %v665_v38 }
 0x28b   :  { %v626_v14 = vsel %vm625_vm4, %v624_v8, %v619_v7  ;;  %v686_v49 = vsub.s32 %v683_v42, %v1287_v57  ;;  %v697_v51 = vadd.s32 4294967200, %v1290_v59  ;;  %v591_v52 = vadd.f32 %v1292_v61, %v553_v60 }
 0x28c   :  { %v633_v18 = vsel %vm632_vm5, %v631_v11, %v626_v14  ;;  %v711_v55 = vadd.s32 4294967184, %v1290_v59  ;;  %v718_v56 = vadd.s32 4294967176, %v1290_v59  ;;  %v707_v3 = vsub.s32 %v704_v54, %v1287_v57 }
 0x28d   :  { %v550_v0 = vpop.xlane.xlu0 %549  ;;  %v640_v24 = vsel %vm639_vm6, %v638_v21, %v633_v18  ;;  %v700_v63 = vsub.s32 %v697_v51, %v1287_v57  ;;  %v680_v2 = vrot.slane %v591_v52, %v679_v45 }
 0x28e   :  { %v647_v30 = vsel %vm646_vm7, %v645_v26, %v640_v24  ;;  %v590_v40 = vadd.f32 %v1292_v61, %v550_v0  ;;  %v714_v59 = vsub.s32 %v711_v55, %v1287_v57  ;;  %v721_v7 = vsub.s32 %v718_v56, %v1287_v57 }
 0x28f   :  { %v654_v36 = vsel %vm653_vm8, %v652_v34, %v647_v30 }
 0x290   :  { %v661_v43 = vsel %vm660_vm9, %v659_v39, %v654_v36  ;;  %v673_v48 = vrot.slane %v590_v40, %v672_v28 }
 0x291   :  { %v556_v10 = vpop.xlane.xlu0 %555  ;;  %v668_v53 = vsel %vm667_vm10, %v666_v46, %v661_v43 }
 0x292   :  { %v592_v50 = vadd.f32 %v1292_v61, %v556_v10  ;;  %v675_v41 = vsel %vm674_vm11, %v673_v48, %v668_v53 }
 0x293   :  { %v682_v8 = vsel %vm681_vm12, %v680_v2, %v675_v41 }
 0x294   :  { %v687_v62 = vrot.slane %v592_v50, %v686_v49 }
 0x295   :  { %v565_v20 = vpop.xlane.xlu0 %564 }
 0x296   :  { %v595_v4 = vadd.f32 %v1292_v61, %v565_v20  ;;  %v689_v11 = vsel %vm688_vm13, %v687_v62, %v682_v8 }
 0x298   :  { %v708_v13 = vrot.slane %v595_v4, %v707_v3 }
 0x299   :  { %v562_v33 = vpop.xlane.xlu0 %561 }
 0x29a   :  { %v594_v0 = vadd.f32 %v1292_v61, %v562_v33 }
 0x29c   :  { %v701_v12 = vrot.slane %v594_v0, %v700_v63 }
 0x29d   :  { %v568_v44 = vpop.xlane.xlu0 %567 }
 0x29e   :  { %v596_v6 = vadd.f32 %v1292_v61, %v568_v44 }
 0x2a0   :  { %v715_v15 = vrot.slane %v596_v6, %v714_v59 }
 0x2a1   :  { %v571_v1 = vpop.xlane.xlu0 %570 }
 0x2a2   :  { %v597_v9 = vadd.f32 %v1292_v61, %v571_v1 }
 0x2a4   :  { %v722_v57 = vrot.slane %v597_v9, %v721_v7 }
 0x2b5   :  { %v559_v60 = vpop.xlane.xlu1 %558 }
 0x2b6   :  { %v593_v5 = vadd.f32 %v1292_v61, %v559_v60 }
 0x2b8   :  { %v694_v10 = vrot.slane %v593_v5, %v693_v58 }
 0x2ba   :  { %v696_v14 = vsel %vm695_vm14, %v694_v10, %v689_v11 }
 0x2bb   :  { %v703_v16 = vsel %vm702_vm15, %v701_v12, %v696_v14 }
 0x2bc   :  { %v710_v17 = vsel %vm709_vm0, %v708_v13, %v703_v16 }
 0x2bd   :  { %v717_v18 = vsel %vm716_vm1, %v715_v15, %v710_v17 }
 0x2be   :  { %v724_v19 = vsel %vm723_vm2, %v722_v57, %v717_v18 }
 0x2bf   :  { %726 = vst [vmem:[#allocation3] sm:$0x1] %v724_v19 }
 0x2c0   :  { %1019 = shalt.err (!%p1016_p4)
}
 0x2c1   :  { %s1020_s25 = scalar_lea.hbm %s1363_s7, 16 }
 0x2c2   :  { %p1021_p5 = scmp.ne.s32.totalorder %s1363_s7, %s1020_s25  ;;  %p1024_p6 = scmp.lt.u32.totalorder %s1020_s25, %s1363_s7 }
 0x2c4   :  { %p1026_p7 = pnand %p1024_p6, %p1021_p5 }
 0x2c6   :  { %1029 = shalt.err (!%p1026_p7)
}
 0x2c7   :  { %736 = dma.vmem_to_hbm [thread:$0]  %s734_s20, 16, %s1363_s7, [#allocation4]  }
 0x2c8   :  { %1030 = dma.done.wait [#allocation4], 16  }
 0x2c9   :  { %1031 = vsyncadd [#allocation4], 4294967280 }
 0x2ca   :  { %740 = vsyncpa [#allocation4], 1 }

</bundles_post_ra>
